<compile_context>
chip_gen: v7x
topology: tpu7x:2x2x1
jax: 0.10.0
libtpu: 0.0.40
codegen_flags: <defaults>
</compile_context>

<pallas_src>
import functools

import jax
import jax.numpy as jnp
import numpy as np
from jax.experimental import pallas as pl
from jax.experimental.pallas import tpu as pltpu


# ---------------------------------------------------------------------------
# helpers
# ---------------------------------------------------------------------------
def _pick_spatial_tile(S, C, itemsize, target_block_bytes):
    """Largest lane-dense tile along the flattened spatial axis such that one
    (1, C, tile) block is ~target_block_bytes. Multiple of 128 lanes, or the
    full axis if it is small."""
    if S <= 256:
        return S
    lanes = target_block_bytes // max(C * itemsize, 1)
    lanes = min(int(lanes), S)
    lanes = (lanes // 128) * 128
    if lanes <= 0:
        lanes = 128
    if lanes >= S:
        return S
    return lanes


def _vmem_limit(in_block_bytes, out_block_bytes):
    # double-buffered input + output blocks plus headroom for compiler scratch
    need = 2 * (in_block_bytes + out_block_bytes) + (4 << 20)
    return int(min(max(need, 16 << 20), 48 << 20))


# ---------------------------------------------------------------------------
# Phase 1: global average pool = tiled sum-reduction over flattened spatial axis
# ---------------------------------------------------------------------------
def _pool_sum_kernel(x_ref, sum_ref, *, total_s, s_tile, need_mask):
    # x_ref:   (1, Cin, S_TILE)   current (batch, spatial-tile) block
    # sum_ref: (1, Cin, 1) f32    accumulator, resident across spatial axis
    si = pl.program_id(1)

    @pl.when(si == 0)
    def _():
        sum_ref[...] = jnp.zeros_like(sum_ref)

    xv = x_ref[0].astype(jnp.float32)                       # (Cin, S_TILE), f32 accumulate
    if need_mask:  # static: only emitted when the last tile is partial
        lane = jax.lax.broadcasted_iota(jnp.int32, (1, s_tile), 1)
        valid = (si * s_tile + lane) < total_s              # (1, S_TILE)
        xv = jnp.where(valid, xv, 0.0)
    part = jnp.sum(xv, axis=-1, keepdims=True)              # (Cin, 1) single lane reduce
    sum_ref[...] += part[None]                              # (1, Cin, 1)


def _spatial_sums(x_flat, *, target_block_bytes=4 << 20):
    """x_flat: (N, C, S) -> (N, C, 1) float32 sums over the last axis."""
    N, C, S = x_flat.shape
    itemsize = jnp.dtype(x_flat.dtype).itemsize
    s_tile = _pick_spatial_tile(S, C, itemsize, target_block_bytes)
    n_tiles = pl.cdiv(S, s_tile)
    need_mask = (S % s_tile) != 0

    kernel = functools.partial(
        _pool_sum_kernel, total_s=S, s_tile=s_tile, need_mask=need_mask)

    in_block = C * s_tile * itemsize
    out_block = C * 4

    return pl.pallas_call(
        kernel,
        out_shape=jax.ShapeDtypeStruct((N, C, 1), jnp.float32),
        grid_spec=pltpu.PrefetchScalarGridSpec(
            num_scalar_prefetch=0,
            grid=(N, n_tiles),
            in_specs=[pl.BlockSpec((1, C, s_tile), lambda n, s: (n, 0, s))],
            out_specs=pl.BlockSpec((1, C, 1), lambda n, s: (n, 0, 0)),
        ),
        compiler_params=pltpu.CompilerParams(
            dimension_semantics=("parallel", "arbitrary"),
            vmem_limit_bytes=_vmem_limit(in_block, out_block),
        ),
    )(x_flat)


# ---------------------------------------------------------------------------
# Phase 2: lane-dense broadcast write (1x1 bilinear upsample == broadcast)
# ---------------------------------------------------------------------------
def _broadcast_kernel(y_ref, o_ref):
    # y_ref: (1, Cout, 1) f32, o_ref: (1, Cout, S_TILE)
    o_ref[...] = jnp.broadcast_to(y_ref[...], o_ref.shape).astype(o_ref.dtype)


def _broadcast_spatial(y, S, out_dtype, *, target_block_bytes=4 << 20):
    """y: (N, Cout) f32 -> (N, Cout, S) out_dtype, value broadcast along S."""
    N, Cout = y.shape
    itemsize = jnp.dtype(out_dtype).itemsize
    s_tile = _pick_spatial_tile(S, Cout, itemsize, target_block_bytes)
    n_tiles = pl.cdiv(S, s_tile)

    in_block = Cout * 4
    out_block = Cout * s_tile * itemsize

    return pl.pallas_call(
        _broadcast_kernel,
        out_shape=jax.ShapeDtypeStruct((N, Cout, S), out_dtype),
        grid_spec=pltpu.PrefetchScalarGridSpec(
            num_scalar_prefetch=0,
            grid=(N, n_tiles),
            in_specs=[pl.BlockSpec((1, Cout, 1), lambda n, s: (n, 0, 0))],
            out_specs=pl.BlockSpec((1, Cout, s_tile), lambda n, s: (n, 0, s)),
        ),
        compiler_params=pltpu.CompilerParams(
            dimension_semantics=("parallel", "parallel"),
            vmem_limit_bytes=_vmem_limit(in_block, out_block),
        ),
    )(y.reshape(N, Cout, 1))


# ---------------------------------------------------------------------------
# Public wrapper: full _AsppPooling forward
# ---------------------------------------------------------------------------
def aspp_pooling(x, weight, gamma, beta, running_mean, running_var, eps=1e-5):
    """x: (N, Cin, H, W); weight: (Cout, Cin, 1, 1). Returns (N, Cout, H, W)."""
    N, Cin, H, W = x.shape
    Cout = weight.shape[0]
    S = H * W

    # ---- Phase 1: big streaming read -> per-(N, Cin) spatial sums ----------
    x_flat = x.reshape(N, Cin, S)                  # free reshape (NCHW contiguous)
    sums = _spatial_sums(x_flat)                   # (N, Cin, 1) f32
    pooled = sums.reshape(N, Cin) * (1.0 / S)      # (N, Cin) global avg pool

    # ---- Tiny 1x1 conv + folded BN + ReLU (hoisted to plain JAX) -----------
    scale = (gamma / jnp.sqrt(running_var + eps)).astype(jnp.float32)   # (Cout,)
    shift = (beta - running_mean * scale).astype(jnp.float32)           # (Cout,)
    w2d = weight.reshape(Cout, Cin).astype(jnp.float32)
    w_scaled = w2d * scale[:, None]                # BN scale folded into weight
    y = jnp.maximum(pooled @ w_scaled.T + shift, 0.0)                   # (N, Cout)

    # ---- Phase 2: big streaming write (lane-dense broadcast) ---------------
    out_flat = _broadcast_spatial(y, S, x.dtype)   # (N, Cout, S)
    return out_flat.reshape(N, Cout, H, W)


# ---------------------------------------------------------------------------
# Pure-JAX reference of the same forward pass
# ---------------------------------------------------------------------------
def _reference(x, weight, gamma, beta, running_mean, running_var, eps=1e-5):
    pooled = jnp.mean(x, axis=(2, 3))                               # (N, Cin)
    conv = pooled @ weight.reshape(weight.shape[0], -1).T           # (N, Cout)
    y = (conv - running_mean) / jnp.sqrt(running_var + eps) * gamma + beta
    y = jnp.maximum(y, 0.0)
    N, Cout = y.shape
    H, W = x.shape[2], x.shape[3]
    return jnp.broadcast_to(y.reshape(N, Cout, 1, 1), (N, Cout, H, W))


if __name__ == "__main__":
    key = jax.random.PRNGKey(0)
    k_x, k_w, k_g, k_b, k_m, k_v = jax.random.split(key, 6)

    N, Cin, Cout, H, W = 2, 4, 4, 16, 16

    x = jax.random.normal(k_x, (N, Cin, H, W), dtype=jnp.float32)
    weight = jax.random.normal(k_w, (Cout, Cin, 1, 1), dtype=jnp.float32) * 0.1
    gamma = jax.random.normal(k_g, (Cout,), dtype=jnp.float32) * 0.1 + 1.0
    beta = jax.random.normal(k_b, (Cout,), dtype=jnp.float32) * 0.1
    running_mean = jax.random.normal(k_m, (Cout,), dtype=jnp.float32) * 0.1
    running_var = jnp.abs(jax.random.normal(k_v, (Cout,), dtype=jnp.float32)) * 0.1 + 1.0

    out = aspp_pooling(x, weight, gamma, beta, running_mean, running_var)
    out = jax.block_until_ready(out)

    ref = _reference(x, weight, gamma, beta, running_mean, running_var)
    np.testing.assert_allclose(np.asarray(out), np.asarray(ref), rtol=1e-5, atol=1e-5)

    print("KERNEL_OK")
</pallas_src>

<mosaic_0001>
module attributes {stable_mosaic.version = 11 : i64} {
  func.func @_pool_sum_kernel(%arg0: i32, %arg1: i32, %arg2: memref<1x4x256xf32, #tpu.memory_space<vmem>>, %arg3: memref<1x4x1xf32, #tpu.memory_space<vmem>>) attributes {dimension_semantics = [#tpu.dimension_semantics<parallel>, #tpu.dimension_semantics<arbitrary>], iteration_bounds = array<i64: 2, 1>, scalar_prefetch = 0 : i64, scratch_operands = 0 : i64, tpu.core_type = #tpu.core_type<tc>, window_params = [{transform_indices = @transform_0, window_bounds = array<i64: 1, 4, 256>}, {transform_indices = @transform_1, window_bounds = array<i64: 1, 4, 1>}]} {
    %c0_i32 = arith.constant 0 : i32
    %0 = arith.cmpi eq, %arg1, %c0_i32 : i32
    %1 = arith.extui %0 : i1 to i32
    %c0_i32_0 = arith.constant 0 : i32
    %2 = arith.cmpi ne, %1, %c0_i32_0 : i32
    scf.if %2 {
      %cst_9 = arith.constant 0.000000e+00 : f32
      %11 = vector.broadcast %cst_9 : f32 to vector<1x4x1xf32>
      %c0_10 = arith.constant 0 : index
      %c0_11 = arith.constant 0 : index
      %c0_12 = arith.constant 0 : index
      %12 = vector.load %arg3[%c0_10, %c0_11, %c0_12] : memref<1x4x1xf32, #tpu.memory_space<vmem>>, vector<1x4x1xf32>
      tpu.vector_store %arg3[%c0_10, %c0_11, %c0_12], %11 {strides = array<i32>} : memref<1x4x1xf32, #tpu.memory_space<vmem>>, vector<1x4x1xf32>,
    } else {
    }
    %c0 = arith.constant 0 : index
    %c0_1 = arith.constant 0 : index
    %c0_2 = arith.constant 0 : index
    %3 = vector.load %arg2[%c0, %c0_1, %c0_2] : memref<1x4x256xf32, #tpu.memory_space<vmem>>, vector<1x4x256xf32>
    %4 = vector.shape_cast %3 : vector<1x4x256xf32> to vector<4x256xf32>
    %cst = arith.constant dense<0.000000e+00> : vector<4xf32>
    %5 = vector.multi_reduction <add>, %4, %cst [1] : vector<4x256xf32> to vector<4xf32>
    %6 = vector.shape_cast %5 : vector<4xf32> to vector<4x1xf32>
    %c0_3 = arith.constant 0 : index
    %c0_4 = arith.constant 0 : index
    %c0_5 = arith.constant 0 : index
    %7 = vector.load %arg3[%c0_3, %c0_4, %c0_5] : memref<1x4x1xf32, #tpu.memory_space<vmem>>, vector<1x4x1xf32>
    %8 = vector.shape_cast %6 : vector<4x1xf32> to vector<1x4x1xf32>
    %9 = arith.addf %7, %8 : vector<1x4x1xf32>
    %c0_6 = arith.constant 0 : index
    %c0_7 = arith.constant 0 : index
    %c0_8 = arith.constant 0 : index
    %10 = vector.load %arg3[%c0_6, %c0_7, %c0_8] : memref<1x4x1xf32, #tpu.memory_space<vmem>>, vector<1x4x1xf32>
    tpu.vector_store %arg3[%c0_6, %c0_7, %c0_8], %9 {strides = array<i32>} : memref<1x4x1xf32, #tpu.memory_space<vmem>>, vector<1x4x1xf32>,
    return
  }
  func.func @transform_0(%arg0: i32, %arg1: i32) -> (i32, i32, i32) {
    %c0_i32 = arith.constant 0 : i32
    %c0_i32_0 = arith.constant 0 : i32
    return %arg0, %c0_i32, %arg1 : i32, i32, i32
  }
  func.func @transform_1(%arg0: i32, %arg1: i32) -> (i32, i32, i32) {
    %c0_i32 = arith.constant 0 : i32
    %c0_i32_0 = arith.constant 0 : i32
    %c0_i32_1 = arith.constant 0 : i32
    return %arg0, %c0_i32, %c0_i32_0 : i32, i32, i32
  }
}

</mosaic_0001>

<bundles_post_ra>
// kernel: tpu_custom_call.1
= control target key start
LH: loop header
LB: loop body
LE: loop exit
PB: predicated region body
PF: predicated region fallthrough
CT: control target
= control target key end

     0   :  { %6 = vsyncpa [#allocation3], 0  ;;  %s535_s0 = inlined_call_operand.hbm [shape: f32[2,4,256], index: 0, kind: input, shape index: {}]   ;;  %s536_s1 = inlined_call_operand.vmem [shape: f32[2,4,1], index: 1, kind: output, shape index: {}]  }
   0x1   :  { %8 = vsyncpa [#allocation3 + $0x1], 0  ;;  %s410_s6 = smov 0   ;;  %s412_s7 = smov 0  }
   0x2   :  { %s414_s8 = smov 0   ;;  %s416_s9 = smov 0  }
   0x3   :  { %s418_s10 = smov 0   ;;  %s420_s11 = smov 0  }
   0x4 LB: > { %s246_s12 = sadd.s32 4294967295, %s396_s11   ;;  %s26_s13 = sadd.s32 1, %s392_s10  ;;  %s396_s11 = sphi %s420_s11, %s14_s11   ;;  %s392_s10 = sphi %s418_s10, %s546_s10   ;;  %s388_s9 = sphi %s416_s9, %s545_s9   ;;  %s384_s8 = sphi %s414_s8, %s544_s8   ;;  %s380_s7 = sphi %s412_s7, %s543_s7   ;;  %s376_s6 = sphi %s410_s6, %s542_s6  }
   0x5   : > { %p28_p0 = scmp.ge.s32.totalorder %s26_s13, 2  ;;  %s35_s14 = sadd.s32 1, %s384_s8 }
   0x6   : > { %p42_p1 = scmp.ne.s32.totalorder %s384_s8, %s380_s7  ;;  %p43_p2 = scmp.eq.s32.totalorder %s396_s11, 0 }
   0x7   : > { %s548_s13 = smov (%p28_p0, %s26_s13), 0  ;;  %p48_p4 = scmp.ne.s32.totalorder %s380_s7, %s376_s6 }
   0x8   : > { %p446_p3 = por %p43_p2, %p42_p1  ;;  %s30_s16 = ssub.s32 %s392_s10, %s548_s13 }
   0x9   : > { %p49_p5 = scmp.eq.s32.totalorder %s246_s12, 0  ;;  %p33_p6 = scmp.eq.s32.totalorder %s30_s16, 0 }
   0xa   : > { %p265_p8 = scmp.lt.s32.totalorder %s396_s11, 2  ;;  %s98_s19 = sand.u32 1, %s384_s8  }
   0xb   : > { %p453_p7 = por %p49_p5, %p48_p4  ;;  %s258_s20 = sshll.u32 %s392_s10, 7 }
   0xc   : > { %s459_s18 = scalar_select %p33_p6, %s384_s8, %s35_s14  }
   0xd   : > { %s250_s21 = sshll.u32 %s98_s19, 3  ;;  %s466_s24 = scalar_lea.hbm %s535_s0, %s258_s20 }
   0xe   : > { %s102_s25 = scalar_lea.vmem [#allocation2], %s250_s21  ;;  %p470_p9 = pnand %p265_p8, %p446_p3 }
   0xf   : > { %s112_s26 = sshll.u32 %s102_s25, 4  ;;  %s99_s28 = scalar_lea.sflag [#allocation3], %s98_s19  ;;  %s474_s26 = int_to_ptr.vmem [resolvable:$true] %s112_s26 }
  0x10   : > { %s316_s29 = scalar_lea.hbm %s466_s24, 128  ;;  %p318_p13 = pneg %p470_p9 }
  0x11   : > { %p317_p12 = scmp.ne.s32.totalorder %s466_s24, %s316_s29  ;;  %s321_s3 = scalar_lea.hbm %s535_s0, 256 }
  0x12   : > { %p322_p2 = scmp.lt.u32.totalorder %s466_s24, %s535_s0  ;;  %p323_p3 = scmp.lt.u32.totalorder %s321_s3, %s316_s29 }
  0x13   : > { %p319_p0 = pnand %p318_p13, %p317_p12  ;;  %p325_p5 = scmp.lt.u32.totalorder %s316_s29, %s466_s24 }
  0x14   : > { %p324_p4 = por %p323_p3, %p322_p2 }
  0x15   : > { %p320_p1 = pneg %p319_p0 }
  0x16   : > { %p326_p6 = por %p325_p5, %p324_p4 }
  0x18   : > { %p327_p8 = pnand %p326_p6, %p320_p1 }
  0x1a   : > { %330 = shalt.err (!%p327_p8)
}
  0x1b   : > { %s331_s6 = scalar_lea.vmem %s474_s26, 128  ;;  %s398_s12 = smov [#allocation2]  }
  0x1c   : > { %p332_p12 = scmp.ne.s32.totalorder %s474_s26, %s331_s6  ;;  %s336_s14 = sshll.u32 %s398_s12, 4  ;;  %s337_s14 = int_to_ptr.vmem [resolvable:$false] %s336_s14 }
  0x1d   : > { %s338_s15 = scalar_lea.vmem %s337_s14, 256  ;;  %p339_p11 = scmp.lt.s32.totalorder %s474_s26, %s337_s14 }
  0x1e   : > { %p334_p0 = pnand %p332_p12, %p318_p13  ;;  %p340_p2 = scmp.lt.s32.totalorder %s338_s15, %s331_s6 }
  0x20   : > { %p335_p10 = pneg %p334_p0  ;;  %p341_p3 = por %p340_p2, %p339_p11 }
  0x22   : > { %p342_p4 = pnand %p341_p3, %p335_p10 }
  0x24   : > { %345 = shalt.err (!%p342_p4)
}
  0x25   : > { %264 = dma.hbm_to_vmem [thread:$0]  (!%p470_p9), %s466_s24, 128, %s474_s26, %s99_s28  }
  0x26   : > { %p540_p1 = scmp.lt.s32.totalorder %s396_s11, 3  ;;  %p541_p5 = scmp.ge.s32.totalorder %s396_s11, 1 }
  0x28   : > { %p118_p13 = pnand %p541_p5, %p540_p1 }
  0x29   : > { %s123_s16 = sand.u32 (!%p118_p13), 1, %s380_s7  }
  0x2a   : > { %121 = sbr.rel (%p118_p13) target bundleno = 201 (0xc9), region = 24  ;;  %s254_s19 = sshll.u32 (!%p118_p13), %s123_s16, 3 }
  0x2b   : > { %s124_s20 = scalar_lea.sflag (!%p118_p13), [#allocation3], %s123_s16  ;;  %s127_s21 = scalar_lea.vmem (!%p118_p13), [#allocation2], %s254_s19 }
  0x31   : > { %371 = dma.done.wait (%p453_p7), %s124_s20, 128  }
  0x32   : > { %373 = vsyncadd (%p453_p7), %s124_s20, 4294967168  ;;  %p146_p10 = scmp.lt.s32.totalorder %s388_s9, 1  ;;  %vm154_vm0 = vcmask 3072   ;;  %vm160_vm1 = vcmask 1043456   ;;  %v399_v0 = vmov 0.0   ;;  %v156_v1 = vld [vmem:[%s127_s21] sm:$0xff] }
  0x33   : > { %v158_v2 = vcombine.high %v156_v1, %v156_v1  ;;  %v161_v3 = vsel %vm160_vm1, %v156_v1, 0.0 }
  0x34   : > { %s550_s9 = smov (!%p146_p10, %s388_s9), 1 }
  0x35   : > { %s255_s22 = sshll.u32 %s550_s9, 2  ;;  %v162_v4 = vsel %vm160_vm1, %v158_v2, 0.0 }
  0x36   : > { %s149_s25 = scalar_lea.vmem %s536_s1, %s255_s22  ;;  %v163_v5 = vadd.f32 %v162_v4, %v161_v3 }
  0x37   : > { %155 = vst.msk [vmem:[%s149_s25] sm:$0xf] %vm154_vm0, %v399_v0 }
  0x38   : > { %164 = vadd.xlane.f32.xlu0 %v163_v5 }
  0x3e   : > { %v166_v6 = vld [vmem:[%s149_s25] sm:$0xf] }
  0xc5   : > { %v165_v7 = vpop.xlane.xlu0 %164 }
  0xc6   : > { %v167_v8 = vadd.f32 %v166_v6, %v165_v7 }
  0xc8   : > { %169 = vst.msk [vmem:[%s149_s25] sm:$0xf] %vm154_vm0, %v167_v8 }
  0xc9 PF: > { %s14_s11 = sadd.s32 1, %s396_s11   ;;  %s542_s6 = smov %s380_s7 }
  0xca   : > { %p11_p7 = scmp.ge.s32.totalorder %s14_s11, 4   ;;  %s543_s7 = smov %s384_s8 }
  0xcb   : > { %s544_s8 = smov %s459_s18  ;;  %s545_s9 = smov %s392_s10 }
  0xcc   : > { %s546_s10 = smov %s548_s13  ;;  %13 = sbr.rel (!%p11_p7) target bundleno = 4 (0x4), region = 68 }
  0xd3   :  { %189 = vsyncpa [#allocation3], 1 }
  0xd4   :  { %191 = vsyncpa [#allocation3 + $0x1], 1 }

</bundles_post_ra>
